<compile_context>
chip_gen: v5e
topology: v5e:2x2
jax: 0.10.0
libtpu: 0.0.40
codegen_flags: <defaults>
</compile_context>

<pallas_src>
import jax
import jax.numpy as jnp
from jax.experimental import pallas as pl
from jax.experimental.pallas import tpu as pltpu

_MiB = 1024 * 1024
_LANE_WIDTHS = (512, 256, 128)  # preferred lane-dense slab widths (multiples of 128)


def _round_up(a: int, b: int) -> int:
    return (a + b - 1) // b * b


def _chip_config():
    """Per-generation streaming parameters (trace-time query, safe fallbacks)."""
    kind = ""
    try:
        kind = jax.devices()[0].device_kind.lower()
    except Exception:
        pass

    vmem_cap = None
    try:
        vmem_cap = int(getattr(pltpu.get_tpu_info(), "vmem_capacity_bytes", 0)) or None
    except Exception:
        vmem_cap = None

    if "v7" in kind:
        # ~3.2 TB/s HBM, 64 MiB VMEM, 2 TensorCores per chip.
        tile_bytes, vmem_limit, num_cores = 8 * _MiB, 48 * _MiB, 2
    elif "v6" in kind:
        # ~1.4 TB/s HBM, 128 MiB VMEM, 1 TC.
        tile_bytes, vmem_limit, num_cores = 8 * _MiB, 64 * _MiB, 1
    elif "v5" in kind and ("lite" in kind or "v5e" in kind):
        # ~0.8 TB/s HBM, 128 MiB VMEM, 1 TC.
        tile_bytes, vmem_limit, num_cores = 4 * _MiB, 32 * _MiB, 1
    else:
        # Unknown / older chip: stay inside every default scoped-VMEM limit.
        tile_bytes, vmem_limit, num_cores = 2 * _MiB, None, 1

    # If the runtime reports VMEM capacity, keep in+out double buffering
    # (~4 x tile, +1 with triple-buffered input) inside ~3/4 of it.
    if vmem_cap:
        cap = int(vmem_cap * 3 // 4)
        vmem_limit = min(vmem_limit, cap) if vmem_limit else cap
        while 4 * tile_bytes > vmem_limit - 2 * _MiB and tile_bytes > _MiB:
            tile_bytes //= 2
    return tile_bytes, vmem_limit, num_cores


def _choose_tile_rows(rows: int, min_rows: int, target_rows: int, num_cores: int) -> int:
    """Rows per grid step; multiple of min_rows unless it equals the full extent."""
    if rows <= target_rows and (num_cores <= 1 or rows < 2 * num_cores * min_rows):
        # Whole array in a single resident tile (block == full row extent, always legal).
        return rows
    steps = max(pl.cdiv(rows, target_rows), 2 * num_cores if num_cores > 1 else 1)
    if num_cores > 1:
        steps = _round_up(steps, num_cores)  # balanced across TensorCores
    tile_rows = min(_round_up(pl.cdiv(rows, steps), min_rows), rows)
    if num_cores > 1 and tile_rows % min_rows == 0:
        # Nudge so the realized step count stays a multiple of the core count.
        while tile_rows > min_rows and pl.cdiv(rows, tile_rows) % num_cores != 0:
            tile_rows -= min_rows
    return tile_rows


def _sigmoid_kernel(x_ref, o_ref):
    # Upcast to f32 for exp (needed on v5e's EUP; no-op for f32 inputs), store
    # back in the native dtype. Numerically stable two-branch formulation:
    #   x >= 0: 1 / (1 + exp(-x))
    #   x <  0: exp(x) / (1 + exp(x)) = z * (1 / (1 + z)),   z = exp(-|x|)
    x = x_ref[...].astype(jnp.float32)
    z = jnp.exp(-jnp.abs(x))      # EUP
    s = 1.0 / (1.0 + z)           # exact divide (keeps the 1e-5 f32 tolerance)
    o_ref[...] = jnp.where(x >= 0, s, z * s).astype(o_ref.dtype)


def sigmoid_pallas(x: jax.Array) -> jax.Array:
    """Elementwise sigmoid of an arbitrary-shaped array via a Pallas TPU kernel."""
    orig_shape = x.shape
    dtype = x.dtype
    itemsize = jnp.dtype(dtype).itemsize
    n = x.size
    if n == 0:
        return x

    tile_bytes, vmem_limit, num_cores = _chip_config()

    # Lane-dense slab width. If some preferred width divides n, the reshape is a
    # pure metadata op (zero-copy). Otherwise fall back to W=128 plus a <=127
    # element pad and an output slice (only for sizes not divisible by 128).
    W = next((w for w in _LANE_WIDTHS if n % w == 0), None)
    padded = W is None
    if padded:
        W = 128
    n_work = _round_up(n, W)
    rows = n_work // W

    # Minimum sublane-tile height per dtype: f32 -> 8, bf16 -> 16, int8/fp8 -> 32.
    min_rows = max(8, 32 // itemsize)
    target_rows = max(min_rows, (tile_bytes // (W * itemsize)) // min_rows * min_rows)
    tile_rows = _choose_tile_rows(rows, min_rows, target_rows, num_cores)
    # Ragged last block (rows % tile_rows != 0) is handled by Pallas' bounds:
    # OOB reads are padded, OOB writes dropped -- no array padding needed.
    grid = (pl.cdiv(rows, tile_rows),)

    x_flat = x.reshape(-1)
    if padded:
        x_flat = jnp.pad(x_flat, (0, n_work - n))
    x2d = x_flat.reshape(rows, W)

    in_spec = pl.BlockSpec((tile_rows, W), lambda i: (i, 0))
    if num_cores > 1 and grid[0] >= 3:
        # Triple-buffer the input on multi-core chips to hide DMA issue jitter
        # (output stays double-buffered); ~one extra tile of VMEM.
        try:
            in_spec = pl.BlockSpec((tile_rows, W), lambda i: (i, 0),
                                   pipeline_mode=pl.Buffered(3))
        except TypeError:
            pass

    cp_kwargs = {"dimension_semantics": ("parallel",)}
    # NOTE: if profiling on v7x shows only one TC streaming, switch to
    # pltpu.CORE_PARALLEL here; "parallel" is the documented default for
    # sharding a grid axis across TensorCores.
    if vmem_limit:
        cp_kwargs["vmem_limit_bytes"] = int(vmem_limit)

    out2d = pl.pallas_call(
        _sigmoid_kernel,
        out_shape=jax.ShapeDtypeStruct((rows, W), dtype),
        grid_spec=pltpu.PrefetchScalarGridSpec(
            num_scalar_prefetch=0,
            grid=grid,
            in_specs=[in_spec],
            out_specs=pl.BlockSpec((tile_rows, W), lambda i: (i, 0)),
        ),
        compiler_params=pltpu.CompilerParams(**cp_kwargs),
        cost_estimate=pl.CostEstimate(
            flops=5 * n_work,
            transcendentals=n_work,
            bytes_accessed=2 * n_work * itemsize,
        ),
    )(x2d)

    if padded:
        return out2d.reshape(-1)[:n].reshape(orig_shape)
    return out2d.reshape(orig_shape)


if __name__ == "__main__":
    key = jax.random.PRNGKey(0)
    # Small NCHW input consistent with the framework's conv modules.
    x = jax.random.normal(key, (2, 4, 16, 16), dtype=jnp.float32)

    out = sigmoid_pallas(x)
    jax.block_until_ready(out)

    # Sanity check against the plain-JAX reference.
    ref = jax.nn.sigmoid(x)
    assert out.shape == x.shape and out.dtype == x.dtype
    assert jnp.max(jnp.abs(out - ref)) < 1e-5

    print("KERNEL_OK")
</pallas_src>

<mosaic_0001>
module attributes {stable_mosaic.version = 11 : i64} {
  func.func @_sigmoid_kernel(%arg0: i32, %arg1: memref<4x512xf32, #tpu.memory_space<vmem>>, %arg2: memref<4x512xf32, #tpu.memory_space<vmem>>) attributes {dimension_semantics = [#tpu.dimension_semantics<parallel>], iteration_bounds = array<i64: 1>, scalar_prefetch = 0 : i64, scratch_operands = 0 : i64, tpu.core_type = #tpu.core_type<tc>, window_params = [{transform_indices = @transform_0, window_bounds = array<i64: 4, 512>}, {transform_indices = @transform_1, window_bounds = array<i64: 4, 512>}]} {
    %c0 = arith.constant 0 : index
    %c0_0 = arith.constant 0 : index
    %0 = vector.load %arg1[%c0, %c0_0] : memref<4x512xf32, #tpu.memory_space<vmem>>, vector<4x512xf32>
    %1 = math.absf %0 : vector<4x512xf32>
    %cst = arith.constant 0.000000e+00 : f32
    %2 = vector.broadcast %cst : f32 to vector<4x512xf32>
    %3 = arith.subf %2, %1 : vector<4x512xf32>
    %4 = math.exp %3 : vector<4x512xf32>
    %cst_1 = arith.constant 1.000000e+00 : f32
    %5 = vector.broadcast %cst_1 : f32 to vector<4x512xf32>
    %6 = arith.addf %5, %4 : vector<4x512xf32>
    %cst_2 = arith.constant 1.000000e+00 : f32
    %7 = vector.broadcast %cst_2 : f32 to vector<4x512xf32>
    %8 = arith.divf %7, %6 : vector<4x512xf32>
    %cst_3 = arith.constant 0.000000e+00 : f32
    %9 = vector.broadcast %cst_3 : f32 to vector<4x512xf32>
    %10 = arith.cmpf oge, %0, %9 : vector<4x512xf32>
    %11 = arith.mulf %4, %8 : vector<4x512xf32>
    %12 = arith.select %10, %8, %11 : vector<4x512xi1>, vector<4x512xf32>
    %c0_4 = arith.constant 0 : index
    %c0_5 = arith.constant 0 : index
    %13 = vector.load %arg2[%c0_4, %c0_5] : memref<4x512xf32, #tpu.memory_space<vmem>>, vector<4x512xf32>
    tpu.vector_store %arg2[%c0_4, %c0_5], %12 {strides = array<i32>} : memref<4x512xf32, #tpu.memory_space<vmem>>, vector<4x512xf32>,
    return
  }
  func.func @transform_0(%arg0: i32) -> (i32, i32) {
    %c0_i32 = arith.constant 0 : i32
    %c0_i32_0 = arith.constant 0 : i32
    return %arg0, %c0_i32 : i32, i32
  }
  func.func @transform_1(%arg0: i32) -> (i32, i32) {
    %c0_i32 = arith.constant 0 : i32
    %c0_i32_0 = arith.constant 0 : i32
    return %arg0, %c0_i32 : i32, i32
  }
}

</mosaic_0001>

<bundles_post_ra>
// kernel: tpu_custom_call.1
= control target key start
LH: loop header
LB: loop body
LE: loop exit
PB: predicated region body
PF: predicated region fallthrough
CT: control target
= control target key end

     0   :  { %6 = vsyncpa [#allocation3], 0  ;;  %s170_s0 = inlined_call_operand.hbm [shape: f32[4,512], index: 0, kind: input, shape index: {}]   ;;  %s171_s1 = inlined_call_operand.hbm [shape: f32[4,512], index: 1, kind: output, shape index: {}]  }
   0x1   :  { %7 = vsyncpa [#allocation4], 0  ;;  %s13_s8 = sshll.u32 %s170_s0, 4  ;;  %s152_s9 = smov [#allocation2]   ;;  %s14_s8 = int_to_ptr.hbm [resolvable:$true] %s13_s8 }
   0x2   :  { %s15_s10 = sshll.u32 %s152_s9, 4  ;;  %s16_s10 = int_to_ptr.vmem [resolvable:$true] %s15_s10 }
   0x3   :  { %18 = dma.hbm_to_vmem [thread:$0]  %s14_s8, 256, %s16_s10, [#allocation3]  }
   0x4   :  { %148 = dma.done.wait [#allocation3], 256  }
   0x5   :  { %149 = vsyncadd [#allocation3], 4294967040  ;;  %v23_v0 = vld [vmem:[#allocation2] sm:$0xff]  ;;  %v24_v1 = vld [vmem:[#allocation2 + $0x8] sm:$0xff]  ;;  %s153_s0 = smov [#allocation5]   ;;  %s80_s14 = sshll.u32 %s171_s1, 4  ;;  %s81_s14 = int_to_ptr.hbm [resolvable:$true] %s80_s14 }
   0x6   :  { %v25_v2 = vand.u32 2147483647, %v23_v0  ;;  %v26_v3 = vand.u32 2147483647, %v24_v1  ;;  %vm65_vm8 = vcmp.ge.f32.partialorder %v23_v0, 0.0  ;;  %s78_s11 = sshll.u32 %s153_s0, 4  ;;  %s79_s11 = int_to_ptr.vmem [resolvable:$true] %s78_s11 }
   0x7   :  { %vm66_vm9 = vcmp.ge.f32.partialorder %v24_v1, 0.0 }
   0x8   :  { %v27_v4 = vsub.f32 0.0, %v25_v2  ;;  %v28_v5 = vsub.f32 0.0, %v26_v3 }
   0xa   :  { %v29_v6 = vmul.f32 1.442695, %v27_v4  ;;  %v31_v7 = vmul.f32 1.442695, %v28_v5 }
   0xc   :  { %92 = vpow2.f32 %v29_v6 }
   0xd   :  { %94 = vpow2.f32 %v31_v7 }
  0x12   :  { %v93_v8 = vpop.eup %92 }
  0x13   :  { %v95_v9 = vpop.eup %94  ;;  %v33_v10 = vadd.f32 1.0, %v93_v8 }
  0x14   :  { %v34_v11 = vadd.f32 1.0, %v95_v9 }
  0x15   :  { %96 = vrcp.f32 %v33_v10  ;;  %vm40_vm0 = vweird.f32 %v33_v10  ;;  %v46_v15 = vand.u32 2147483648, %v33_v10  ;;  %v44_v18 = vand.u32 2147483647, %v33_v10 }
  0x16   :  { %98 = vrcp.f32 %v34_v11  ;;  %v61_v19 = vand.u32 2147483648, %v34_v11  ;;  %vm55_vm2 = vweird.f32 %v34_v11  ;;  %v59_v21 = vand.u32 2147483647, %v34_v11 }
  0x17   :  { %v47_v23 = vor.u32 1.1754944e-38, %v46_v15  ;;  %vm45_vm5 = vcmp.eq.f32.partialorder %v44_v18, 8.507059e+37 }
  0x18   :  { %v62_v26 = vor.u32 1.1754944e-38, %v61_v19  ;;  %vm60_vm7 = vcmp.eq.f32.partialorder %v59_v21, 8.507059e+37 }
  0x1b   :  { %v97_v12 = vpop.eup %96 }
  0x1c   :  { %v99_v13 = vpop.eup %98  ;;  %v36_v14 = vmul.f32 %v97_v12, %v33_v10  ;;  %vm41_vm1 = vweird.f32 %v97_v12 }
  0x1d   :  { %v51_v16 = vmul.f32 %v99_v13, %v34_v11  ;;  %vm56_vm3 = vweird.f32 %v99_v13  ;;  %vm42_vm4 = vmor %vm40_vm0, %vm41_vm1 }
  0x1e   :  { %v37_v17 = vsub.f32 1.0, %v36_v14  ;;  %vm57_vm6 = vmor %vm55_vm2, %vm56_vm3 }
  0x1f   :  { %v52_v20 = vsub.f32 1.0, %v51_v16 }
  0x20   :  { %v38_v22 = vmul.f32 %v97_v12, %v37_v17 }
  0x21   :  { %v53_v24 = vmul.f32 %v99_v13, %v52_v20 }
  0x22   :  { %v39_v25 = vadd.f32 %v97_v12, %v38_v22 }
  0x23   :  { %v54_v27 = vadd.f32 %v99_v13, %v53_v24 }
  0x24   :  { %v43_v28 = vsel %vm42_vm4, %v97_v12, %v39_v25 }
  0x25   :  { %v48_v29 = vsel %vm45_vm5, %v47_v23, %v43_v28  ;;  %v58_v30 = vsel %vm57_vm6, %v99_v13, %v54_v27 }
  0x26   :  { %v67_v31 = vmul.f32 %v93_v8, %v48_v29  ;;  %v63_v32 = vsel %vm60_vm7, %v62_v26, %v58_v30 }
  0x27   :  { %v68_v33 = vmul.f32 %v95_v9, %v63_v32 }
  0x28   :  { %v69_v34 = vsel %vm65_vm8, %v48_v29, %v67_v31 }
  0x29   :  { %71 = vst [vmem:[#allocation5] sm:$0xff] %v69_v34  ;;  %v70_v35 = vsel %vm66_vm9, %v63_v32, %v68_v33 }
  0x2a   :  { %72 = vst [vmem:[#allocation5 + $0x8] sm:$0xff] %v70_v35 }
  0x2b   :  { %83 = dma.vmem_to_hbm [thread:$0]  %s79_s11, 256, %s81_s14, [#allocation4]  }
  0x2c   :  { %150 = dma.done.wait [#allocation4], 256  }
  0x2d   :  { %151 = vsyncadd [#allocation4], 4294967040 }
  0x2e   :  { %88 = vsyncpa [#allocation3], 1 }
  0x2f   :  { %89 = vsyncpa [#allocation4], 1 }

</bundles_post_ra>
